<compile_context>
chip_gen: v7x
topology: tpu7x:2x2x1
jax: 0.10.0
libtpu: 0.0.40
codegen_flags: <defaults>
</compile_context>

<pallas_src>
import functools
import math

import jax
import jax.numpy as jnp
from jax import lax
from jax.experimental import pallas as pl
from jax.experimental.pallas import tpu as pltpu  # noqa: F401  (TPU backend)

D_MODEL = 32
N_HEADS = 4
D_FF = 64
EPS = 1e-5  # torch.nn.LayerNorm default eps


def _layernorm(x, gamma, beta):
    mu = jnp.mean(x, axis=-1, keepdims=True)
    var = jnp.mean((x - mu) ** 2, axis=-1, keepdims=True)  # biased var (PyTorch LN)
    return (x - mu) * lax.rsqrt(var + EPS) * gamma + beta


def encoder_layer_kernel(x_ref, mask_ref,
                         wqkv_ref, bqkv_ref, wo_ref, bo_ref,
                         g1_ref, be1_ref,
                         w1_ref, b1_ref, w2_ref, b2_ref,
                         g2_ref, be2_ref,
                         o_ref, *, B, S, D):
    dk = D // N_HEADS
    scale = 1.0 / math.sqrt(dk)

    x2 = x_ref[...]                       # (B*S, D)  all batches fused into M
    neg_mask = mask_ref[...] == 0.0       # (B, 1, S) 1.0 = attend, 0.0 = masked

    # ---- fused QKV projection: one (B*S, D) @ (D, 3D) MXU matmul ----
    qkv = jnp.dot(x2, wqkv_ref[...],
                  preferred_element_type=jnp.float32) + bqkv_ref[...]   # (B*S, 3D)
    qkv3 = qkv.reshape(B, S, 3 * D)       # split leading dim only (cheap)

    # ---- multi-head self attention (static head loop, batched over B) ----
    head_outs = []
    for h in range(N_HEADS):
        qh = qkv3[:, :, h * dk:(h + 1) * dk]                    # (B, S, dk)
        kh = qkv3[:, :, D + h * dk:D + (h + 1) * dk]            # (B, S, dk)
        vh = qkv3[:, :, 2 * D + h * dk:2 * D + (h + 1) * dk]    # (B, S, dk)

        scores = jnp.einsum('bqd,bkd->bqk', qh, kh,
                            preferred_element_type=jnp.float32) * scale  # (B,S,S)
        scores = jnp.where(neg_mask, -1e9, scores)              # (B,1,S) broadcast
        m = jnp.max(scores, axis=-1, keepdims=True)
        p = jnp.exp(scores - m)
        # Exact reciprocal: approx=True evaluates at bf16 precision and broke
        # the 2e-3 correctness tolerance; the denominator is only (B,S,1).
        inv = 1.0 / jnp.sum(p, axis=-1, keepdims=True)
        oh = jnp.einsum('bqk,bkd->bqd', p, vh,
                        preferred_element_type=jnp.float32) * inv        # (B,S,dk)
        head_outs.append(oh)

    attn = jnp.concatenate(head_outs, axis=-1).reshape(B * S, D)         # (B*S, D)
    attn = jnp.dot(attn, wo_ref[...],
                   preferred_element_type=jnp.float32) + bo_ref[...]

    # TODO(synk): dropout inside self_attn / feed_forward omitted (inference semantics).

    # ---- residual + LayerNorm 1 ----
    n1 = _layernorm(attn + x2, g1_ref[...], be1_ref[...])

    # ---- positionwise feed-forward: Linear -> ReLU -> Linear (M = B*S) ----
    ff = jnp.dot(n1, w1_ref[...], preferred_element_type=jnp.float32) + b1_ref[...]
    ff = jnp.maximum(ff, 0.0)
    ff = jnp.dot(ff, w2_ref[...], preferred_element_type=jnp.float32) + b2_ref[...]

    # ---- residual + LayerNorm 2 ----
    out2 = _layernorm(ff + n1, g2_ref[...], be2_ref[...])                # (B*S, D)

    # ---- lane-dense writeback: (B, S*D) row-major slab ----
    # element [b, s*D + d] == out[b, s, d]; built from static slices + concat
    # so the store is a full-lane vst (D=32 alone would be a masked store).
    out3 = out2.reshape(B, S, D)
    o_ref[...] = jnp.concatenate([out3[:, s, :] for s in range(S)], axis=-1)


def encoder_layer(x, mask, params):
    (wq, bq, wk, bk, wv, bv, wo, bo,
     g1, be1, w1, b1, w2, b2, g2, be2) = params
    B, S, D = x.shape
    assert D == D_MODEL and D % N_HEADS == 0

    # One-time QKV fusion in the wrapper (free under XLA; not in the kernel).
    wqkv = jnp.concatenate([wq, wk, wv], axis=1)      # (D, 3D)
    bqkv = jnp.concatenate([bq, bk, bv], axis=1)      # (1, 3D)
    x2d = x.reshape(B * S, D)                         # row-major: free reshape

    kernel = functools.partial(encoder_layer_kernel, B=B, S=S, D=D)
    out_flat = pl.pallas_call(
        kernel,
        out_shape=jax.ShapeDtypeStruct((B, S * D), jnp.float32),
        # No grid: single VMEM-resident block -> weights DMA'd exactly once,
        # no per-step pipeline overhead at these sizes.
    )(x2d, mask, wqkv, bqkv, wo, bo, g1, be1, w1, b1, w2, b2, g2, be2)
    return out_flat.reshape(B, S, D)


# ---------------- pure-JAX reference (for correctness check) ----------------
def ref_encoder_layer(x, mask, params):
    (wq, bq, wk, bk, wv, bv, wo, bo, g1, be1, w1, b1, w2, b2, g2, be2) = params
    B, S, D = x.shape
    dk = D // N_HEADS
    scale = 1.0 / math.sqrt(dk)

    def split_heads(t):  # (B,S,D) -> (B,H,S,dk)
        return t.reshape(B, S, N_HEADS, dk).transpose(0, 2, 1, 3)

    q = split_heads(x @ wq + bq)
    k = split_heads(x @ wk + bk)
    v = split_heads(x @ wv + bv)
    scores = jnp.einsum("bhqd,bhkd->bhqk", q, k) * scale
    m4 = mask[:, None, :, :]                      # (B,1,1,S)
    scores = jnp.where(m4 == 0.0, -1e9, scores)
    p = jax.nn.softmax(scores, axis=-1)
    attn = jnp.einsum("bhqk,bhkd->bhqd", p, v).transpose(0, 2, 1, 3).reshape(B, S, D)
    attn = attn @ wo + bo

    def ln(t, g, b):
        mu = jnp.mean(t, axis=-1, keepdims=True)
        var = jnp.mean((t - mu) ** 2, axis=-1, keepdims=True)
        return (t - mu) / jnp.sqrt(var + EPS) * g + b

    h1 = attn + x
    n1 = ln(h1, g1, be1)
    ff = jnp.maximum(n1 @ w1 + b1, 0.0) @ w2 + b2
    return ln(ff + n1, g2, be2)


def make_params(key):
    ks = jax.random.split(key, 8)
    s_d = 1.0 / math.sqrt(D_MODEL)
    s_f = 1.0 / math.sqrt(D_FF)
    wq = jax.random.normal(ks[0], (D_MODEL, D_MODEL), jnp.float32) * s_d
    wk = jax.random.normal(ks[1], (D_MODEL, D_MODEL), jnp.float32) * s_d
    wv = jax.random.normal(ks[2], (D_MODEL, D_MODEL), jnp.float32) * s_d
    wo = jax.random.normal(ks[3], (D_MODEL, D_MODEL), jnp.float32) * s_d
    w1 = jax.random.normal(ks[4], (D_MODEL, D_FF), jnp.float32) * s_d
    w2 = jax.random.normal(ks[5], (D_FF, D_MODEL), jnp.float32) * s_f
    bq = jax.random.normal(ks[6], (1, D_MODEL), jnp.float32) * 0.01
    bk = jnp.zeros((1, D_MODEL), jnp.float32)
    bv = jnp.zeros((1, D_MODEL), jnp.float32)
    bo = jax.random.normal(ks[7], (1, D_MODEL), jnp.float32) * 0.01
    b1 = jnp.zeros((1, D_FF), jnp.float32)
    b2 = jnp.zeros((1, D_MODEL), jnp.float32)
    g1 = jnp.ones((1, D_MODEL), jnp.float32)
    be1 = jnp.zeros((1, D_MODEL), jnp.float32)
    g2 = jnp.ones((1, D_MODEL), jnp.float32)
    be2 = jnp.zeros((1, D_MODEL), jnp.float32)
    return (wq, bq, wk, bk, wv, bv, wo, bo, g1, be1, w1, b1, w2, b2, g2, be2)


if __name__ == "__main__":
    B, S = 2, 8
    key = jax.random.PRNGKey(0)
    kx, kp = jax.random.split(key)
    x = jax.random.normal(kx, (B, S, D_MODEL), jnp.float32)

    # padding mask: first example full length, second has last 2 positions padded
    lengths = jnp.array([S, S - 2])
    mask = (jnp.arange(S)[None, :] < lengths[:, None]).astype(jnp.float32)
    mask = mask.reshape(B, 1, S)

    params = make_params(kp)

    out = encoder_layer(x, mask, params)
    out = jax.block_until_ready(out)

    ref = ref_encoder_layer(x, mask, params)
    assert out.shape == (B, S, D_MODEL)
    # Exact softmax normalization now; 2e-3 leaves headroom only for
    # MXU f32 matmul / transcendental rounding differences vs. the XLA ref.
    assert jnp.allclose(out, ref, atol=2e-3, rtol=2e-3), "mismatch vs reference"

    print("KERNEL_OK")
</pallas_src>

<mosaic_0001>
module attributes {stable_mosaic.version = 11 : i64} {
  func.func @encoder_layer_kernel(%arg0: memref<16x32xf32, #tpu.memory_space<vmem>>, %arg1: memref<2x1x8xf32, #tpu.memory_space<vmem>>, %arg2: memref<32x96xf32, #tpu.memory_space<vmem>>, %arg3: memref<1x96xf32, #tpu.memory_space<vmem>>, %arg4: memref<32x32xf32, #tpu.memory_space<vmem>>, %arg5: memref<1x32xf32, #tpu.memory_space<vmem>>, %arg6: memref<1x32xf32, #tpu.memory_space<vmem>>, %arg7: memref<1x32xf32, #tpu.memory_space<vmem>>, %arg8: memref<32x64xf32, #tpu.memory_space<vmem>>, %arg9: memref<1x64xf32, #tpu.memory_space<vmem>>, %arg10: memref<64x32xf32, #tpu.memory_space<vmem>>, %arg11: memref<1x32xf32, #tpu.memory_space<vmem>>, %arg12: memref<1x32xf32, #tpu.memory_space<vmem>>, %arg13: memref<1x32xf32, #tpu.memory_space<vmem>>, %arg14: memref<2x256xf32, #tpu.memory_space<vmem>>) attributes {dimension_semantics = [], scalar_prefetch = 0 : i64, scratch_operands = 0 : i64, tpu.core_type = #tpu.core_type<tc>} {
    %c0 = arith.constant 0 : index
    %c0_0 = arith.constant 0 : index
    %0 = vector.load %arg0[%c0, %c0_0] : memref<16x32xf32, #tpu.memory_space<vmem>>, vector<16x32xf32>
    %c0_1 = arith.constant 0 : index
    %c0_2 = arith.constant 0 : index
    %c0_3 = arith.constant 0 : index
    %1 = vector.load %arg1[%c0_1, %c0_2, %c0_3] : memref<2x1x8xf32, #tpu.memory_space<vmem>>, vector<2x1x8xf32>
    %cst = arith.constant 0.000000e+00 : f32
    %2 = vector.broadcast %cst : f32 to vector<2x1x8xf32>
    %3 = arith.cmpf oeq, %1, %2 : vector<2x1x8xf32>
    %c0_4 = arith.constant 0 : index
    %c0_5 = arith.constant 0 : index
    %4 = vector.load %arg2[%c0_4, %c0_5] : memref<32x96xf32, #tpu.memory_space<vmem>>, vector<32x96xf32>
    %cst_6 = arith.constant dense<0.000000e+00> : vector<16x96xf32>
    %5 = tpu.matmul %0, %4, %cst_6 {dimension_numbers = #tpu.dot_dimension_numbers<[1], [0], [0], [1], [0, 0, 1, 1], [], []>} : vector<16x32xf32>, vector<32x96xf32>, vector<16x96xf32> -> vector<16x96xf32>
    %c0_7 = arith.constant 0 : index
    %c0_8 = arith.constant 0 : index
    %6 = vector.load %arg3[%c0_7, %c0_8] : memref<1x96xf32, #tpu.memory_space<vmem>>, vector<1x96xf32>
    %7 = vector.broadcast %6 : vector<1x96xf32> to vector<16x96xf32>
    %8 = arith.addf %5, %7 : vector<16x96xf32>
    %9 = vector.shape_cast %8 : vector<16x96xf32> to vector<2x8x96xf32>
    %10 = vector.extract_strided_slice %9 {offsets = [0, 0, 0], sizes = [2, 8, 8], strides = [1, 1, 1]} : vector<2x8x96xf32> to vector<2x8x8xf32>
    %11 = vector.extract_strided_slice %9 {offsets = [0, 0, 32], sizes = [2, 8, 8], strides = [1, 1, 1]} : vector<2x8x96xf32> to vector<2x8x8xf32>
    %12 = vector.extract_strided_slice %9 {offsets = [0, 0, 64], sizes = [2, 8, 8], strides = [1, 1, 1]} : vector<2x8x96xf32> to vector<2x8x8xf32>
    "tpu.trace_start"() <{level = 10 : i32, message = "bqd,bkd->bqk"}> : () -> ()
    %cst_9 = arith.constant dense<0.000000e+00> : vector<2x8x8xf32>
    %13 = tpu.matmul %10, %11, %cst_9 {dimension_numbers = #tpu.dot_dimension_numbers<[2], [2], [1], [1], [0, 0, 0, 1, 1, 1], [0], [0]>} : vector<2x8x8xf32>, vector<2x8x8xf32>, vector<2x8x8xf32> -> vector<2x8x8xf32>
    "tpu.trace_stop"() : () -> ()
    %cst_10 = arith.constant 0.353553385 : f32
    %14 = vector.broadcast %cst_10 : f32 to vector<2x8x8xf32>
    %15 = arith.mulf %13, %14 : vector<2x8x8xf32>
    %cst_11 = arith.constant -1.000000e+09 : f32
    %16 = vector.shape_cast %3 : vector<2x1x8xi1> to vector<2x1x8xi1>
    %17 = vector.broadcast %16 : vector<2x1x8xi1> to vector<2x8x8xi1>
    %18 = vector.broadcast %cst_11 : f32 to vector<2x8x8xf32>
    %19 = arith.select %17, %18, %15 : vector<2x8x8xi1>, vector<2x8x8xf32>
    %cst_12 = arith.constant dense<0xFF800000> : vector<2x8xf32>
    %20 = vector.multi_reduction <maximumf>, %19, %cst_12 [2] : vector<2x8x8xf32> to vector<2x8xf32>
    %21 = vector.shape_cast %20 : vector<2x8xf32> to vector<2x8x1xf32>
    %22 = vector.broadcast %21 : vector<2x8x1xf32> to vector<2x8x8xf32>
    %23 = arith.subf %19, %22 : vector<2x8x8xf32>
    %24 = math.exp %23 : vector<2x8x8xf32>
    %cst_13 = arith.constant dense<0.000000e+00> : vector<2x8xf32>
    %25 = vector.multi_reduction <add>, %24, %cst_13 [2] : vector<2x8x8xf32> to vector<2x8xf32>
    %26 = vector.shape_cast %25 : vector<2x8xf32> to vector<2x8x1xf32>
    %cst_14 = arith.constant 1.000000e+00 : f32
    %27 = vector.broadcast %cst_14 : f32 to vector<2x8x1xf32>
    %28 = arith.divf %27, %26 : vector<2x8x1xf32>
    "tpu.trace_start"() <{level = 10 : i32, message = "bqk,bkd->bqd"}> : () -> ()
    %cst_15 = arith.constant dense<0.000000e+00> : vector<2x8x8xf32>
    %29 = tpu.matmul %24, %12, %cst_15 {dimension_numbers = #tpu.dot_dimension_numbers<[2], [1], [1], [2], [0, 0, 0, 1, 1, 2], [0], [0]>} : vector<2x8x8xf32>, vector<2x8x8xf32>, vector<2x8x8xf32> -> vector<2x8x8xf32>
    "tpu.trace_stop"() : () -> ()
    %30 = vector.broadcast %28 : vector<2x8x1xf32> to vector<2x8x8xf32>
    %31 = arith.mulf %29, %30 : vector<2x8x8xf32>
    %32 = vector.extract_strided_slice %9 {offsets = [0, 0, 8], sizes = [2, 8, 8], strides = [1, 1, 1]} : vector<2x8x96xf32> to vector<2x8x8xf32>
    %33 = vector.extract_strided_slice %9 {offsets = [0, 0, 40], sizes = [2, 8, 8], strides = [1, 1, 1]} : vector<2x8x96xf32> to vector<2x8x8xf32>
    %34 = vector.extract_strided_slice %9 {offsets = [0, 0, 72], sizes = [2, 8, 8], strides = [1, 1, 1]} : vector<2x8x96xf32> to vector<2x8x8xf32>
    "tpu.trace_start"() <{level = 10 : i32, message = "bqd,bkd->bqk"}> : () -> ()
    %cst_16 = arith.constant dense<0.000000e+00> : vector<2x8x8xf32>
    %35 = tpu.matmul %32, %33, %cst_16 {dimension_numbers = #tpu.dot_dimension_numbers<[2], [2], [1], [1], [0, 0, 0, 1, 1, 1], [0], [0]>} : vector<2x8x8xf32>, vector<2x8x8xf32>, vector<2x8x8xf32> -> vector<2x8x8xf32>
    "tpu.trace_stop"() : () -> ()
    %cst_17 = arith.constant 0.353553385 : f32
    %36 = vector.broadcast %cst_17 : f32 to vector<2x8x8xf32>
    %37 = arith.mulf %35, %36 : vector<2x8x8xf32>
    %cst_18 = arith.constant -1.000000e+09 : f32
    %38 = vector.shape_cast %3 : vector<2x1x8xi1> to vector<2x1x8xi1>
    %39 = vector.broadcast %38 : vector<2x1x8xi1> to vector<2x8x8xi1>
    %40 = vector.broadcast %cst_18 : f32 to vector<2x8x8xf32>
    %41 = arith.select %39, %40, %37 : vector<2x8x8xi1>, vector<2x8x8xf32>
    %cst_19 = arith.constant dense<0xFF800000> : vector<2x8xf32>
    %42 = vector.multi_reduction <maximumf>, %41, %cst_19 [2] : vector<2x8x8xf32> to vector<2x8xf32>
    %43 = vector.shape_cast %42 : vector<2x8xf32> to vector<2x8x1xf32>
    %44 = vector.broadcast %43 : vector<2x8x1xf32> to vector<2x8x8xf32>
    %45 = arith.subf %41, %44 : vector<2x8x8xf32>
    %46 = math.exp %45 : vector<2x8x8xf32>
    %cst_20 = arith.constant dense<0.000000e+00> : vector<2x8xf32>
    %47 = vector.multi_reduction <add>, %46, %cst_20 [2] : vector<2x8x8xf32> to vector<2x8xf32>
    %48 = vector.shape_cast %47 : vector<2x8xf32> to vector<2x8x1xf32>
    %cst_21 = arith.constant 1.000000e+00 : f32
    %49 = vector.broadcast %cst_21 : f32 to vector<2x8x1xf32>
    %50 = arith.divf %49, %48 : vector<2x8x1xf32>
    "tpu.trace_start"() <{level = 10 : i32, message = "bqk,bkd->bqd"}> : () -> ()
    %cst_22 = arith.constant dense<0.000000e+00> : vector<2x8x8xf32>
    %51 = tpu.matmul %46, %34, %cst_22 {dimension_numbers = #tpu.dot_dimension_numbers<[2], [1], [1], [2], [0, 0, 0, 1, 1, 2], [0], [0]>} : vector<2x8x8xf32>, vector<2x8x8xf32>, vector<2x8x8xf32> -> vector<2x8x8xf32>
    "tpu.trace_stop"() : () -> ()
    %52 = vector.broadcast %50 : vector<2x8x1xf32> to vector<2x8x8xf32>
    %53 = arith.mulf %51, %52 : vector<2x8x8xf32>
    %54 = vector.extract_strided_slice %9 {offsets = [0, 0, 16], sizes = [2, 8, 8], strides = [1, 1, 1]} : vector<2x8x96xf32> to vector<2x8x8xf32>
    %55 = vector.extract_strided_slice %9 {offsets = [0, 0, 48], sizes = [2, 8, 8], strides = [1, 1, 1]} : vector<2x8x96xf32> to vector<2x8x8xf32>
    %56 = vector.extract_strided_slice %9 {offsets = [0, 0, 80], sizes = [2, 8, 8], strides = [1, 1, 1]} : vector<2x8x96xf32> to vector<2x8x8xf32>
    "tpu.trace_start"() <{level = 10 : i32, message = "bqd,bkd->bqk"}> : () -> ()
    %cst_23 = arith.constant dense<0.000000e+00> : vector<2x8x8xf32>
    %57 = tpu.matmul %54, %55, %cst_23 {dimension_numbers = #tpu.dot_dimension_numbers<[2], [2], [1], [1], [0, 0, 0, 1, 1, 1], [0], [0]>} : vector<2x8x8xf32>, vector<2x8x8xf32>, vector<2x8x8xf32> -> vector<2x8x8xf32>
    "tpu.trace_stop"() : () -> ()
    %cst_24 = arith.constant 0.353553385 : f32
    %58 = vector.broadcast %cst_24 : f32 to vector<2x8x8xf32>
    %59 = arith.mulf %57, %58 : vector<2x8x8xf32>
    %cst_25 = arith.constant -1.000000e+09 : f32
    %60 = vector.shape_cast %3 : vector<2x1x8xi1> to vector<2x1x8xi1>
    %61 = vector.broadcast %60 : vector<2x1x8xi1> to vector<2x8x8xi1>
    %62 = vector.broadcast %cst_25 : f32 to vector<2x8x8xf32>
    %63 = arith.select %61, %62, %59 : vector<2x8x8xi1>, vector<2x8x8xf32>
    %cst_26 = arith.constant dense<0xFF800000> : vector<2x8xf32>
    %64 = vector.multi_reduction <maximumf>, %63, %cst_26 [2] : vector<2x8x8xf32> to vector<2x8xf32>
    %65 = vector.shape_cast %64 : vector<2x8xf32> to vector<2x8x1xf32>
    %66 = vector.broadcast %65 : vector<2x8x1xf32> to vector<2x8x8xf32>
    %67 = arith.subf %63, %66 : vector<2x8x8xf32>
    %68 = math.exp %67 : vector<2x8x8xf32>
    %cst_27 = arith.constant dense<0.000000e+00> : vector<2x8xf32>
    %69 = vector.multi_reduction <add>, %68, %cst_27 [2] : vector<2x8x8xf32> to vector<2x8xf32>
    %70 = vector.shape_cast %69 : vector<2x8xf32> to vector<2x8x1xf32>
    %cst_28 = arith.constant 1.000000e+00 : f32
    %71 = vector.broadcast %cst_28 : f32 to vector<2x8x1xf32>
    %72 = arith.divf %71, %70 : vector<2x8x1xf32>
    "tpu.trace_start"() <{level = 10 : i32, message = "bqk,bkd->bqd"}> : () -> ()
    %cst_29 = arith.constant dense<0.000000e+00> : vector<2x8x8xf32>
    %73 = tpu.matmul %68, %56, %cst_29 {dimension_numbers = #tpu.dot_dimension_numbers<[2], [1], [1], [2], [0, 0, 0, 1, 1, 2], [0], [0]>} : vector<2x8x8xf32>, vector<2x8x8xf32>, vector<2x8x8xf32> -> vector<2x8x8xf32>
    "tpu.trace_stop"() : () -> ()
    %74 = vector.broadcast %72 : vector<2x8x1xf32> to vector<2x8x8xf32>
    %75 = arith.mulf %73, %74 : vector<2x8x8xf32>
    %76 = vector.extract_strided_slice %9 {offsets = [0, 0, 24], sizes = [2, 8, 8], strides = [1, 1, 1]} : vector<2x8x96xf32> to vector<2x8x8xf32>
    %77 = vector.extract_strided_slice %9 {offsets = [0, 0, 56], sizes = [2, 8, 8], strides = [1, 1, 1]} : vector<2x8x96xf32> to vector<2x8x8xf32>
    %78 = vector.extract_strided_slice %9 {offsets = [0, 0, 88], sizes = [2, 8, 8], strides = [1, 1, 1]} : vector<2x8x96xf32> to vector<2x8x8xf32>
    "tpu.trace_start"() <{level = 10 : i32, message = "bqd,bkd->bqk"}> : () -> ()
    %cst_30 = arith.constant dense<0.000000e+00> : vector<2x8x8xf32>
    %79 = tpu.matmul %76, %77, %cst_30 {dimension_numbers = #tpu.dot_dimension_numbers<[2], [2], [1], [1], [0, 0, 0, 1, 1, 1], [0], [0]>} : vector<2x8x8xf32>, vector<2x8x8xf32>, vector<2x8x8xf32> -> vector<2x8x8xf32>
    "tpu.trace_stop"() : () -> ()
    %cst_31 = arith.constant 0.353553385 : f32
    %80 = vector.broadcast %cst_31 : f32 to vector<2x8x8xf32>
    %81 = arith.mulf %79, %80 : vector<2x8x8xf32>
    %cst_32 = arith.constant -1.000000e+09 : f32
    %82 = vector.shape_cast %3 : vector<2x1x8xi1> to vector<2x1x8xi1>
    %83 = vector.broadcast %82 : vector<2x1x8xi1> to vector<2x8x8xi1>
    %84 = vector.broadcast %cst_32 : f32 to vector<2x8x8xf32>
    %85 = arith.select %83, %84, %81 : vector<2x8x8xi1>, vector<2x8x8xf32>
    %cst_33 = arith.constant dense<0xFF800000> : vector<2x8xf32>
    %86 = vector.multi_reduction <maximumf>, %85, %cst_33 [2] : vector<2x8x8xf32> to vector<2x8xf32>
    %87 = vector.shape_cast %86 : vector<2x8xf32> to vector<2x8x1xf32>
    %88 = vector.broadcast %87 : vector<2x8x1xf32> to vector<2x8x8xf32>
    %89 = arith.subf %85, %88 : vector<2x8x8xf32>
    %90 = math.exp %89 : vector<2x8x8xf32>
    %cst_34 = arith.constant dense<0.000000e+00> : vector<2x8xf32>
    %91 = vector.multi_reduction <add>, %90, %cst_34 [2] : vector<2x8x8xf32> to vector<2x8xf32>
    %92 = vector.shape_cast %91 : vector<2x8xf32> to vector<2x8x1xf32>
    %cst_35 = arith.constant 1.000000e+00 : f32
    %93 = vector.broadcast %cst_35 : f32 to vector<2x8x1xf32>
    %94 = arith.divf %93, %92 : vector<2x8x1xf32>
    "tpu.trace_start"() <{level = 10 : i32, message = "bqk,bkd->bqd"}> : () -> ()
    %cst_36 = arith.constant dense<0.000000e+00> : vector<2x8x8xf32>
    %95 = tpu.matmul %90, %78, %cst_36 {dimension_numbers = #tpu.dot_dimension_numbers<[2], [1], [1], [2], [0, 0, 0, 1, 1, 2], [0], [0]>} : vector<2x8x8xf32>, vector<2x8x8xf32>, vector<2x8x8xf32> -> vector<2x8x8xf32>
    "tpu.trace_stop"() : () -> ()
    %96 = vector.broadcast %94 : vector<2x8x1xf32> to vector<2x8x8xf32>
    %97 = arith.mulf %95, %96 : vector<2x8x8xf32>
    %98 = tpu.concatenate %31, %53, %75, %97 in 2 : vector<2x8x8xf32>, vector<2x8x8xf32>, vector<2x8x8xf32>, vector<2x8x8xf32> -> vector<2x8x32xf32>
    %99 = vector.shape_cast %98 : vector<2x8x32xf32> to vector<16x32xf32>
    %c0_37 = arith.constant 0 : index
    %c0_38 = arith.constant 0 : index
    %100 = vector.load %arg4[%c0_37, %c0_38] : memref<32x32xf32, #tpu.memory_space<vmem>>, vector<32x32xf32>
    %cst_39 = arith.constant dense<0.000000e+00> : vector<16x32xf32>
    %101 = tpu.matmul %99, %100, %cst_39 {dimension_numbers = #tpu.dot_dimension_numbers<[1], [0], [0], [1], [0, 0, 1, 1], [], []>} : vector<16x32xf32>, vector<32x32xf32>, vector<16x32xf32> -> vector<16x32xf32>
    %c0_40 = arith.constant 0 : index
    %c0_41 = arith.constant 0 : index
    %102 = vector.load %arg5[%c0_40, %c0_41] : memref<1x32xf32, #tpu.memory_space<vmem>>, vector<1x32xf32>
    %103 = vector.broadcast %102 : vector<1x32xf32> to vector<16x32xf32>
    %104 = arith.addf %101, %103 : vector<16x32xf32>
    %105 = arith.addf %104, %0 : vector<16x32xf32>
    %c0_42 = arith.constant 0 : index
    %c0_43 = arith.constant 0 : index
    %106 = vector.load %arg6[%c0_42, %c0_43] : memref<1x32xf32, #tpu.memory_space<vmem>>, vector<1x32xf32>
    %c0_44 = arith.constant 0 : index
    %c0_45 = arith.constant 0 : index
    %107 = vector.load %arg7[%c0_44, %c0_45] : memref<1x32xf32, #tpu.memory_space<vmem>>, vector<1x32xf32>
    %cst_46 = arith.constant dense<0.000000e+00> : vector<16xf32>
    %108 = vector.multi_reduction <add>, %105, %cst_46 [1] : vector<16x32xf32> to vector<16xf32>
    %109 = vector.shape_cast %108 : vector<16xf32> to vector<16x1xf32>
    %cst_47 = arith.constant 3.200000e+01 : f32
    %110 = vector.broadcast %cst_47 : f32 to vector<16x1xf32>
    %111 = arith.divf %109, %110 : vector<16x1xf32>
    %112 = vector.broadcast %111 : vector<16x1xf32> to vector<16x32xf32>
    %113 = arith.subf %105, %112 : vector<16x32xf32>
    %114 = arith.mulf %113, %113 : vector<16x32xf32>
    %cst_48 = arith.constant dense<0.000000e+00> : vector<16xf32>
    %115 = vector.multi_reduction <add>, %114, %cst_48 [1] : vector<16x32xf32> to vector<16xf32>
    %116 = vector.shape_cast %115 : vector<16xf32> to vector<16x1xf32>
    %cst_49 = arith.constant 3.200000e+01 : f32
    %117 = vector.broadcast %cst_49 : f32 to vector<16x1xf32>
    %118 = arith.divf %116, %117 : vector<16x1xf32>
    %119 = vector.broadcast %111 : vector<16x1xf32> to vector<16x32xf32>
    %120 = arith.subf %105, %119 : vector<16x32xf32>
    %cst_50 = arith.constant 9.99999974E-6 : f32
    %121 = vector.broadcast %cst_50 : f32 to vector<16x1xf32>
    %122 = arith.addf %118, %121 : vector<16x1xf32>
    %123 = math.rsqrt %122 : vector<16x1xf32>
    %124 = vector.broadcast %123 : vector<16x1xf32> to vector<16x32xf32>
    %125 = arith.mulf %120, %124 : vector<16x32xf32>
    %126 = vector.broadcast %106 : vector<1x32xf32> to vector<16x32xf32>
    %127 = arith.mulf %125, %126 : vector<16x32xf32>
    %128 = vector.broadcast %107 : vector<1x32xf32> to vector<16x32xf32>
    %129 = arith.addf %127, %128 : vector<16x32xf32>
    %c0_51 = arith.constant 0 : index
    %c0_52 = arith.constant 0 : index
    %130 = vector.load %arg8[%c0_51, %c0_52] : memref<32x64xf32, #tpu.memory_space<vmem>>, vector<32x64xf32>
    %cst_53 = arith.constant dense<0.000000e+00> : vector<16x64xf32>
    %131 = tpu.matmul %129, %130, %cst_53 {dimension_numbers = #tpu.dot_dimension_numbers<[1], [0], [0], [1], [0, 0, 1, 1], [], []>} : vector<16x32xf32>, vector<32x64xf32>, vector<16x64xf32> -> vector<16x64xf32>
    %c0_54 = arith.constant 0 : index
    %c0_55 = arith.constant 0 : index
    %132 = vector.load %arg9[%c0_54, %c0_55] : memref<1x64xf32, #tpu.memory_space<vmem>>, vector<1x64xf32>
    %133 = vector.broadcast %132 : vector<1x64xf32> to vector<16x64xf32>
    %134 = arith.addf %131, %133 : vector<16x64xf32>
    %cst_56 = arith.constant 0.000000e+00 : f32
    %135 = vector.broadcast %cst_56 : f32 to vector<16x64xf32>
    %136 = arith.maximumf %134, %135 : vector<16x64xf32>
    %c0_57 = arith.constant 0 : index
    %c0_58 = arith.constant 0 : index
    %137 = vector.load %arg10[%c0_57, %c0_58] : memref<64x32xf32, #tpu.memory_space<vmem>>, vector<64x32xf32>
    %cst_59 = arith.constant dense<0.000000e+00> : vector<16x32xf32>
    %138 = tpu.matmul %136, %137, %cst_59 {dimension_numbers = #tpu.dot_dimension_numbers<[1], [0], [0], [1], [0, 0, 1, 1], [], []>} : vector<16x64xf32>, vector<64x32xf32>, vector<16x32xf32> -> vector<16x32xf32>
    %c0_60 = arith.constant 0 : index
    %c0_61 = arith.constant 0 : index
    %139 = vector.load %arg11[%c0_60, %c0_61] : memref<1x32xf32, #tpu.memory_space<vmem>>, vector<1x32xf32>
    %140 = vector.broadcast %139 : vector<1x32xf32> to vector<16x32xf32>
    %141 = arith.addf %138, %140 : vector<16x32xf32>
    %142 = arith.addf %141, %129 : vector<16x32xf32>
    %c0_62 = arith.constant 0 : index
    %c0_63 = arith.constant 0 : index
    %143 = vector.load %arg12[%c0_62, %c0_63] : memref<1x32xf32, #tpu.memory_space<vmem>>, vector<1x32xf32>
    %c0_64 = arith.constant 0 : index
    %c0_65 = arith.constant 0 : index
    %144 = vector.load %arg13[%c0_64, %c0_65] : memref<1x32xf32, #tpu.memory_space<vmem>>, vector<1x32xf32>
    %cst_66 = arith.constant dense<0.000000e+00> : vector<16xf32>
    %145 = vector.multi_reduction <add>, %142, %cst_66 [1] : vector<16x32xf32> to vector<16xf32>
    %146 = vector.shape_cast %145 : vector<16xf32> to vector<16x1xf32>
    %cst_67 = arith.constant 3.200000e+01 : f32
    %147 = vector.broadcast %cst_67 : f32 to vector<16x1xf32>
    %148 = arith.divf %146, %147 : vector<16x1xf32>
    %149 = vector.broadcast %148 : vector<16x1xf32> to vector<16x32xf32>
    %150 = arith.subf %142, %149 : vector<16x32xf32>
    %151 = arith.mulf %150, %150 : vector<16x32xf32>
    %cst_68 = arith.constant dense<0.000000e+00> : vector<16xf32>
    %152 = vector.multi_reduction <add>, %151, %cst_68 [1] : vector<16x32xf32> to vector<16xf32>
    %153 = vector.shape_cast %152 : vector<16xf32> to vector<16x1xf32>
    %cst_69 = arith.constant 3.200000e+01 : f32
    %154 = vector.broadcast %cst_69 : f32 to vector<16x1xf32>
    %155 = arith.divf %153, %154 : vector<16x1xf32>
    %156 = vector.broadcast %148 : vector<16x1xf32> to vector<16x32xf32>
    %157 = arith.subf %142, %156 : vector<16x32xf32>
    %cst_70 = arith.constant 9.99999974E-6 : f32
    %158 = vector.broadcast %cst_70 : f32 to vector<16x1xf32>
    %159 = arith.addf %155, %158 : vector<16x1xf32>
    %160 = math.rsqrt %159 : vector<16x1xf32>
    %161 = vector.broadcast %160 : vector<16x1xf32> to vector<16x32xf32>
    %162 = arith.mulf %157, %161 : vector<16x32xf32>
    %163 = vector.broadcast %143 : vector<1x32xf32> to vector<16x32xf32>
    %164 = arith.mulf %162, %163 : vector<16x32xf32>
    %165 = vector.broadcast %144 : vector<1x32xf32> to vector<16x32xf32>
    %166 = arith.addf %164, %165 : vector<16x32xf32>
    %167 = vector.shape_cast %166 : vector<16x32xf32> to vector<2x8x32xf32>
    %168 = vector.extract_strided_slice %167 {offsets = [0, 0, 0], sizes = [2, 1, 32], strides = [1, 1, 1]} : vector<2x8x32xf32> to vector<2x1x32xf32>
    %169 = vector.shape_cast %168 : vector<2x1x32xf32> to vector<2x32xf32>
    %170 = vector.extract_strided_slice %167 {offsets = [0, 1, 0], sizes = [2, 1, 32], strides = [1, 1, 1]} : vector<2x8x32xf32> to vector<2x1x32xf32>
    %171 = vector.shape_cast %170 : vector<2x1x32xf32> to vector<2x32xf32>
    %172 = vector.extract_strided_slice %167 {offsets = [0, 2, 0], sizes = [2, 1, 32], strides = [1, 1, 1]} : vector<2x8x32xf32> to vector<2x1x32xf32>
    %173 = vector.shape_cast %172 : vector<2x1x32xf32> to vector<2x32xf32>
    %174 = vector.extract_strided_slice %167 {offsets = [0, 3, 0], sizes = [2, 1, 32], strides = [1, 1, 1]} : vector<2x8x32xf32> to vector<2x1x32xf32>
    %175 = vector.shape_cast %174 : vector<2x1x32xf32> to vector<2x32xf32>
    %176 = vector.extract_strided_slice %167 {offsets = [0, 4, 0], sizes = [2, 1, 32], strides = [1, 1, 1]} : vector<2x8x32xf32> to vector<2x1x32xf32>
    %177 = vector.shape_cast %176 : vector<2x1x32xf32> to vector<2x32xf32>
    %178 = vector.extract_strided_slice %167 {offsets = [0, 5, 0], sizes = [2, 1, 32], strides = [1, 1, 1]} : vector<2x8x32xf32> to vector<2x1x32xf32>
    %179 = vector.shape_cast %178 : vector<2x1x32xf32> to vector<2x32xf32>
    %180 = vector.extract_strided_slice %167 {offsets = [0, 6, 0], sizes = [2, 1, 32], strides = [1, 1, 1]} : vector<2x8x32xf32> to vector<2x1x32xf32>
    %181 = vector.shape_cast %180 : vector<2x1x32xf32> to vector<2x32xf32>
    %182 = vector.extract_strided_slice %167 {offsets = [0, 7, 0], sizes = [2, 1, 32], strides = [1, 1, 1]} : vector<2x8x32xf32> to vector<2x1x32xf32>
    %183 = vector.shape_cast %182 : vector<2x1x32xf32> to vector<2x32xf32>
    %184 = tpu.concatenate %169, %171, %173, %175, %177, %179, %181, %183 in 1 : vector<2x32xf32>, vector<2x32xf32>, vector<2x32xf32>, vector<2x32xf32>, vector<2x32xf32>, vector<2x32xf32>, vector<2x32xf32>, vector<2x32xf32> -> vector<2x256xf32>
    %c0_71 = arith.constant 0 : index
    %c0_72 = arith.constant 0 : index
    %185 = vector.load %arg14[%c0_71, %c0_72] : memref<2x256xf32, #tpu.memory_space<vmem>>, vector<2x256xf32>
    tpu.vector_store %arg14[%c0_71, %c0_72], %184 {strides = array<i32>} : memref<2x256xf32, #tpu.memory_space<vmem>>, vector<2x256xf32>,
    return
  }
}

</mosaic_0001>

<bundles_post_ra>
// kernel: tpu_custom_call.1
= control target key start
LH: loop header
LB: loop body
LE: loop exit
PB: predicated region body
PF: predicated region fallthrough
CT: control target
= control target key end

     0   :  { %19 = vsyncpa [#allocation3], 0  ;;  %s2918_s0 = inlined_call_operand.hbm [shape: f32[16,32], index: 0, kind: input, shape index: {}]   ;;  %s2919_s1 = inlined_call_operand.vmem [shape: f32[2,1,8], index: 1, kind: input, shape index: {}]   ;;  %s2920_s2 = inlined_call_operand.vmem [shape: f32[32,96], index: 2, kind: input, shape index: {}]   ;;  %s2921_s3 = inlined_call_operand.vmem [shape: f32[1,96], index: 3, kind: input, shape index: {}]   ;;  %s2922_s4 = inlined_call_operand.vmem [shape: f32[32,32], index: 4, kind: input, shape index: {}]   ;;  %s2923_s5 = inlined_call_operand.vmem [shape: f32[1,32], index: 5, kind: input, shape index: {}]   ;;  %s2924_s6 = inlined_call_operand.vmem [shape: f32[1,32], index: 6, kind: input, shape index: {}]   ;;  %s2925_s7 = inlined_call_operand.hbm [shape: f32[1,32], index: 7, kind: input, shape index: {}]   ;;  %s2926_s8 = inlined_call_operand.vmem [shape: f32[32,64], index: 8, kind: input, shape index: {}]   ;;  %s2927_s9 = inlined_call_operand.hbm [shape: f32[1,64], index: 9, kind: input, shape index: {}]   ;;  %s2928_s10 = inlined_call_operand.vmem [shape: f32[64,32], index: 10, kind: input, shape index: {}]   ;;  %s2929_s11 = inlined_call_operand.vmem [shape: f32[1,32], index: 11, kind: input, shape index: {}]   ;;  %s2930_s12 = inlined_call_operand.vmem [shape: f32[1,32], index: 12, kind: input, shape index: {}]   ;;  %s2931_s13 = inlined_call_operand.vmem [shape: f32[1,32], index: 13, kind: input, shape index: {}]   ;;  %s2932_s14 = inlined_call_operand.hbm [shape: f32[2,256], index: 14, kind: output, shape index: {}]  }
   0x1   :  { %20 = vsyncpa [#allocation6], 0 }
   0x2   :  { %21 = vsyncpa [#allocation4], 0  ;;  %s2457_s29 = smov [#allocation5]   ;;  %s2458_s15 = smov [#allocation2]  }
   0x3   :  { %s52_s30 = sshll.u32 %s2457_s29, 4  ;;  %s27_s16 = sshll.u32 %s2458_s15, 4  ;;  %s53_s30 = int_to_ptr.vmem [resolvable:$true] %s52_s30  ;;  %s2555_s16 = int_to_ptr.vmem [resolvable:$true] %s27_s16 }
   0x4   :  { %s2363_s19 = scalar_lea.hbm %s2925_s7, 16 }
   0x5   :  { %p2364_p0 = scmp.ne.s32.totalorder %s2925_s7, %s2363_s19  ;;  %p2367_p1 = scmp.lt.u32.totalorder %s2363_s19, %s2925_s7 }
   0x7   :  { %p2369_p2 = pnand %p2367_p1, %p2364_p0 }
   0x9   :  { %2372 = shalt.err (!%p2369_p2)
}
   0xa   :  { %s2373_s24 = scalar_lea.vmem %s53_s30, 16  ;;  %s2377_s25 = scalar_lea.vmem %s53_s30, 32 }
   0xb   :  { %p2374_p3 = scmp.ne.s32.totalorder %s53_s30, %s2373_s24  ;;  %p2378_p4 = scmp.lt.s32.totalorder %s53_s30, %s53_s30 }
   0xc   :  { %p2379_p5 = scmp.lt.s32.totalorder %s2377_s25, %s2373_s24 }
   0xe   :  { %p2380_p6 = por %p2379_p5, %p2378_p4 }
  0x10   :  { %p2381_p7 = pnand %p2380_p6, %p2374_p3 }
  0x12   :  { %2384 = shalt.err (!%p2381_p7)
}
  0x13   :  { %55 = dma.hbm_to_vmem [thread:$0]  %s2925_s7, 16, %s53_s30, [#allocation6]  }
  0x14   :  { %s2385_s15 = scalar_lea.hbm %s2918_s0, 256 }
  0x15   :  { %p2386_p8 = scmp.ne.s32.totalorder %s2918_s0, %s2385_s15  ;;  %p2389_p9 = scmp.lt.u32.totalorder %s2385_s15, %s2918_s0 }
  0x17   :  { %p2391_p10 = pnand %p2389_p9, %p2386_p8 }
  0x19   :  { %2394 = shalt.err (!%p2391_p10)
}
  0x1a   :  { %s2395_s21 = scalar_lea.vmem %s2555_s16, 256  ;;  %p2400_p12 = scmp.lt.s32.totalorder %s2555_s16, %s2555_s16 }
  0x1b   :  { %p2396_p11 = scmp.ne.s32.totalorder %s2555_s16, %s2395_s21  ;;  %p2401_p13 = scmp.lt.s32.totalorder %s2395_s21, %s2395_s21 }
  0x1d   :  { %p2402_p0 = por %p2401_p13, %p2400_p12 }
  0x1f   :  { %p2403_p1 = pnand %p2402_p0, %p2396_p11 }
  0x21   :  { %2406 = shalt.err (!%p2403_p1)
}
  0x22   :  { %s2459_s7 = smov 128   ;;  %s2460_s30 = smov 8  }
  0x23   :  { %33 = dma.hbm_to_vmem [thread:$0]  %s2918_s0, 256, %s2555_s16, [#allocation3], %s2459_s7, %s2459_s7, %s2460_s30  }
  0x24   :  { %s2461_s24 = smov [#allocation7]   ;;  %s2407_s28 = scalar_lea.hbm %s2927_s9, 16 }
  0x25   :  { %s64_s25 = sshll.u32 %s2461_s24, 4  ;;  %p2408_p2 = scmp.ne.s32.totalorder %s2927_s9, %s2407_s28  ;;  %s65_s25 = int_to_ptr.vmem [resolvable:$true] %s64_s25 }
  0x26   :  { %p2411_p3 = scmp.lt.u32.totalorder %s2407_s28, %s2927_s9 }
  0x28   :  { %p2413_p4 = pnand %p2411_p3, %p2408_p2 }
  0x2a   :  { %2416 = shalt.err (!%p2413_p4)
}
  0x2b   :  { %s2417_s19 = scalar_lea.vmem %s65_s25, 16  ;;  %s2421_s0 = scalar_lea.vmem %s65_s25, 32 }
  0x2c   :  { %p2418_p5 = scmp.ne.s32.totalorder %s65_s25, %s2417_s19  ;;  %p2422_p6 = scmp.lt.s32.totalorder %s65_s25, %s65_s25 }
  0x2d   :  { %p2423_p7 = scmp.lt.s32.totalorder %s2421_s0, %s2417_s19 }
  0x2f   :  { %p2424_p8 = por %p2423_p7, %p2422_p6 }
  0x31   :  { %p2425_p9 = pnand %p2424_p8, %p2418_p5 }
  0x33   :  { %2428 = shalt.err (!%p2425_p9)
}
  0x34   :  { %67 = dma.hbm_to_vmem [thread:$0]  %s2927_s9, 16, %s65_s25, [#allocation6]  }
  0x35   :  { %2451 = dma.done.wait [#allocation3], 256  }
  0x36   :  { %2452 = vsyncadd [#allocation3], 4294967040 }
  0x37   :  { %2453 = dma.done.wait [#allocation6], 32  }
  0x38   :  { %2454 = vsyncadd [#allocation6], 4294967264  ;;  %vm102_vm0 = vcmask 261120   ;;  %v91_v0 = vld [vmem:[%s2920_s2] sm:$0xff]  ;;  %v92_v1 = vld [vmem:[%s2920_s2 + $0x8] sm:$0xff]  ;;  %v2462_v8 = vmov 0.0   ;;  %v343_v17 = vlaneseq }
  0x39   :  { %v93_v2 = vld [vmem:[%s2920_s2 + $0x10] sm:$0xff]  ;;  %v2260_v3 = vpack.c.bf16 %v92_v1, %v91_v0  ;;  %v94_v4 = vld [vmem:[%s2920_s2 + $0x18] sm:$0xff]  ;;  %v2611_v5 = vld [vmem:[#allocation2] sm:$0xff]  ;;  %2149 = vmatprep.subr.mxu0 %v2462_v8  ;;  %vm2463_vm1 = vmmov 0   ;;  %s2464_s28 = smov 96   ;;  %s2465_s29 = smov 64  }
  0x3a   :  { %v2264_v6 = vpack.c.bf16 %v94_v4, %v93_v2  ;;  %2136 = vmatprep.mubr.msk.f32.mxu1 %vm102_vm0, %v2611_v5  ;;  %v2615_v7 = vld [vmem:[#allocation2 + $0x8] sm:$0xff]  ;;  %2151 = vmatprep.mubr.msk.f32.mxu0 %vm2463_vm1, %v2462_v8  ;;  %v2027_v9 = vld [vmem:[%s2921_s3] ss:$0 sm:$0xff]  ;;  %s2466_s15 = smov 88   ;;  %s2467_s3 = smov 120   ;;  %vm187_vm2 = vcmask 64512  }
  0x3b   :  { %2261 = vmatprep.subr.bf16.mxu1 %v2260_v3  ;;  %s2468_s17 = smov 56   ;;  %v87_v18 = vld [vmem:[%s2919_s1] sm:$0x1]  ;;  %v344_v19 = vshrl.u32 %v343_v17, 7  ;;  %v88_v20 = vld [vmem:[%s2919_s1 + $0x1] sm:$0x1] }
  0x3c   :  { %2263 = vmatpush3.bf16.msra.mxu1 %v2260_v3  ;;  %vm89_vm3 = vcmp.eq.f32.partialorder %v87_v18, 0.0  ;;  %v2469_v22 = vmov 0   ;;  %vm90_vm4 = vcmp.eq.f32.partialorder %v88_v20, 0.0  ;;  %s2470_s1 = smov 80   ;;  %s2471_s20 = smov 112   ;;  %vm1568_vm7 = vcmask 195584  }
  0x3d   :  { %2265 = vmatprep.subr.bf16.mxu1 %v2264_v6  ;;  %v345_v21 = vsub.s32 0, %v344_v19  ;;  %v341_v23 = vsel %vm89_vm3, 1, %v2469_v22  ;;  %v342_v25 = vsel %vm90_vm4, 1, %v2469_v22  ;;  %s2472_s21 = smov 48   ;;  %s2473_s7 = smov 72   ;;  %vm1565_vm8 = vcmask 130048  }
  0x3e   :  { %s2474_s22 = smov 104   ;;  %s2475_s23 = smov 40   ;;  %vm1819_vm9 = vcmask 523264   ;;  %vm1950_vm10 = vcmask 1041409   ;;  %vm1994_vm11 = vcmask 785408  }
  0x3f   :  { %v2663_v24 = vrot.slane %v341_v23, %v345_v21  ;;  %v2666_v27 = vrot.slane %v342_v25, %v345_v21  ;;  %s2476_s24 = smov 16  }
  0x40   :  { %2267 = vmatpush3.bf16.msra.mxu1 %v2264_v6 }
  0x41   :  { %2139 = vmatprep.subr.mxu1 %v2462_v8  ;;  %vm351_vm5 = vcmp.eq.s32.totalorder %v2663_v24, 1  ;;  %vm352_vm6 = vcmp.eq.s32.totalorder %v2666_v27, 1 }
  0x43   :  { %2137 = vmatmul.mubr.msk.f32.vlgmr.msra.gmra.mrb[0].mxu1 %vm102_vm0, %v2615_v7 }
  0x44   :  { %2141 = vmatprep.mubr.msk.f32.mxu1 %vm2463_vm1, %v2462_v8 }
 0x116   :  { %v2138_v10 = vpop.f32.mrb[0].mxu1 }
 0x117   :  { %v175_v11 = vpop.f32.mrb[1].mxu1  ;;  %v2632_v13 = vadd.f32 %v2138_v10, %v2027_v9 }
 0x118   :  { %v2628_v12 = vadd.f32 %v2027_v9, %v175_v11 }
 0x11a   :  { %185 = vrot.lane.b32.xlu0 %v2628_v12, %s2464_s28 }
 0x11e   :  { %263 = vrot.lane.b32.xlu0 %v2632_v13, %s2464_s28 }
 0x122   :  { %377 = vrot.lane.b32.xlu0 %v2628_v12, %s2465_s29 }
 0x126   :  { %533 = vrot.lane.b32.xlu0 %v2628_v12, %s2466_s15 }
 0x12a   :  { %611 = vrot.lane.b32.xlu0 %v2632_v13, %s2466_s15 }
 0x12e   :  { %531 = vrot.lane.b32.xlu0 %v2628_v12, %s2467_s3 }
 0x132   :  { %609 = vrot.lane.b32.xlu0 %v2632_v13, %s2467_s3 }
 0x136   :  { %713 = vrot.lane.b32.xlu0 %v2628_v12, %s2468_s17 }
 0x18c   :  { %v186_v14 = vpop.permute.xlu0 %185 }
 0x18d   :  { %2140 = vmatpush3.xpose.msk.msra.mxu1 %vm187_vm2, %v186_v14 }
 0x18e   :  { %2144 = vmatprep.subr.mxu1 %v2462_v8 }
 0x190   :  { %2142 = vmatmul.mubr.msk.f32.vlgmr.msra.gmra.mrb[2].mxu1 %vm187_vm2, %v2628_v12  ;;  %v264_v15 = vpop.permute.xlu0 %263 }
 0x191   :  { %2145 = vmatpush3.xpose.msk.msra.mxu1 %vm187_vm2, %v264_v15  ;;  %2146 = vmatprep.mubr.msk.f32.mxu1 %vm2463_vm1, %v2462_v8 }
 0x192   :  { %2154 = vmatprep.subr.mxu1 %v2462_v8 }
 0x194   :  { %2147 = vmatmul.mubr.msk.f32.vlgmr.msra.gmra.mrb[4].mxu1 %vm187_vm2, %v2632_v13  ;;  %v378_v16 = vpop.permute.xlu0 %377 }
 0x195   :  { %2150 = vmatpush3.msra.mxu0 %v378_v16  ;;  %2156 = vmatprep.mubr.msk.f32.mxu1 %vm2463_vm1, %v2462_v8 }
 0x196   :  { %2159 = vmatprep.subr.mxu0 %v2462_v8 }
 0x198   :  { %v534_v37 = vpop.permute.xlu0 %533 }
 0x19c   :  { %v612_v40 = vpop.permute.xlu0 %611 }
 0x1a0   :  { %v532_v45 = vpop.permute.xlu0 %531 }
 0x1a4   :  { %v610_v47 = vpop.permute.xlu0 %609 }
 0x1a8   :  { %v714_v50 = vpop.permute.xlu0 %713 }
 0x263   :  { %v258_v26 = vpop.f32.mrb[2].mxu1 }
 0x264   :  { %v339_v28 = vmul.f32 0.35355338, %v258_v26  ;;  %v2143_v29 = vpop.f32.mrb[3].mxu1 }
 0x266   :  { %v353_v30 = vsel %vm351_vm5, -1e+09, %v339_v28 }
 0x267   :  { %v335_v31 = vpop.f32.mrb[4].mxu1  ;;  %v355_v32 = vsel %vm187_vm2, %v353_v30, -inf }
 0x268   :  { %v340_v33 = vmul.f32 0.35355338, %v335_v31  ;;  %356 = vmax.xlane.f32.xlu1 %v355_v32  ;;  %v2148_v34 = vpop.f32.mrb[5].mxu1 }
 0x26a   :  { %v354_v35 = vsel %vm352_vm6, -1e+09, %v340_v33 }
 0x26b   :  { %v358_v36 = vsel %vm187_vm2, %v354_v35, -inf }
 0x26c   :  { %359 = vmax.xlane.f32.xlu1 %v358_v36 }
 0x27d   :  { %453 = vrot.lane.b32.xlu1 %v2632_v13, %s2465_s29 }
 0x281   :  { %789 = vrot.lane.b32.xlu1 %v2632_v13, %s2468_s17  ;;  %s2477_s17 = smov 24  }
 0x285   :  { %869 = vrot.lane.b32.xlu1 %v2628_v12, %s2470_s1 }
 0x2f5   :  { %v357_v38 = vpop.xlane.xlu1 %356 }
 0x2f6   :  { %v361_v39 = vsub.f32 %v353_v30, %v357_v38 }
 0x2f8   :  { %v363_v41 = vmul.f32 1.442695, %v361_v39 }
 0x2f9   :  { %v360_v42 = vpop.xlane.xlu1 %359 }
 0x2fa   :  { %2323 = vpow2.f32 %v363_v41  ;;  %v362_v43 = vsub.f32 %v354_v35, %v360_v42 }
 0x2fc   :  { %v365_v44 = vmul.f32 1.442695, %v362_v43 }
 0x2fd   :  { %v454_v46 = vpop.permute.xlu1 %453 }
 0x2fe   :  { %2325 = vpow2.f32 %v365_v44  ;;  %2155 = vmatpush3.msra.mxu1 %v454_v46 }
 0x2ff   :  { %2164 = vmatprep.subr.mxu1 %v2462_v8 }
 0x301   :  { %v790_v51 = vpop.permute.xlu1 %789 }
 0x304   :  { %v2682_v48 = vpop.eup %2323 }
 0x305   :  { %2152 = vmatmul.mubr.msk.f32.vlgmr.msra.gmra.mrb[0].mxu0 %vm187_vm2, %v2682_v48  ;;  %v870_v2 = vpop.permute.xlu1 %869 }
 0x306   :  { %2160 = vmatpush3.xpose.msk.msra.mxu0 %vm187_vm2, %v534_v37  ;;  %2161 = vmatprep.mubr.msk.f32.mxu0 %vm2463_vm1, %v2462_v8 }
 0x307   :  { %2169 = vmatprep.subr.mxu0 %v2462_v8 }
 0x308   :  { %v2690_v49 = vpop.eup %2325 }
 0x309   :  { %2157 = vmatmul.mubr.msk.f32.vlgmr.msra.gmra.mrb[6].mxu1 %vm187_vm2, %v2690_v49  ;;  %2162 = vmatmul.mubr.msk.f32.vlgmr.msra.gmra.mrb[2].mxu0 %vm187_vm2, %v532_v45 }
 0x30a   :  { %2165 = vmatpush3.xpose.msk.msra.mxu1 %vm187_vm2, %v612_v40  ;;  %2170 = vmatpush3.msra.mxu0 %v714_v50 }
 0x30b   :  { %2166 = vmatprep.mubr.msk.f32.mxu1 %vm2463_vm1, %v2462_v8  ;;  %2174 = vmatprep.subr.mxu1 %v2462_v8 }
 0x30c   :  { %2171 = vmatprep.mubr.msk.f32.mxu0 %vm2463_vm1, %v2462_v8  ;;  %2179 = vmatprep.subr.mxu0 %v2462_v8 }
 0x30d   :  { %2167 = vmatmul.mubr.msk.f32.vlgmr.msra.gmra.mrb[8].mxu1 %vm187_vm2, %v610_v47 }
 0x30e   :  { %2175 = vmatpush3.msra.mxu1 %v790_v51  ;;  %2176 = vmatprep.mubr.msk.f32.mxu1 %vm2463_vm1, %v2462_v8 }
 0x30f   :  { %2184 = vmatprep.subr.mxu1 %v2462_v8 }
 0x3d8   :  { %v2706_v52 = vpop.f32.mrb[0].mxu0 }
 0x3d9   :  { %v2153_v53 = vpop.f32.mrb[1].mxu0 }
 0x3dc   :  { %v2708_v54 = vpop.f32.mrb[6].mxu1  ;;  %v605_v55 = vpop.f32.mrb[2].mxu0 }
 0x3dd   :  { %v687_v56 = vmul.f32 0.35355338, %v605_v55  ;;  %v2158_v57 = vpop.f32.mrb[7].mxu1  ;;  %v2163_v58 = vpop.f32.mrb[3].mxu0 }
 0x3df   :  { %v689_v59 = vsel %vm351_vm5, -1e+09, %v687_v56 }
 0x3e0   :  { %v683_v60 = vpop.f32.mrb[8].mxu1  ;;  %v691_v61 = vsel %vm187_vm2, %v689_v59, -inf }
 0x3e1   :  { %v688_v62 = vmul.f32 0.35355338, %v683_v60  ;;  %692 = vmax.xlane.f32.xlu1 %v691_v61  ;;  %v2168_v63 = vpop.f32.mrb[9].mxu1 }
 0x3e3   :  { %v690_v0 = vsel %vm352_vm6, -1e+09, %v688_v62 }
 0x3e4   :  { %v694_v1 = vsel %vm187_vm2, %v690_v0, -inf }
 0x3e5   :  { %695 = vmax.xlane.f32.xlu0 %v694_v1 }
 0x3f2   :  { %867 = vrot.lane.b32.xlu1 %v2628_v12, %s2471_s20 }
 0x3f6   :  { %1125 = vrot.lane.b32.xlu1 %v2632_v13, %s2472_s21 }
 0x3fa   :  { %1205 = vrot.lane.b32.xlu1 %v2628_v12, %s2473_s7 }
 0x3fb   :  { %947 = vrot.lane.b32.xlu0 %v2632_v13, %s2470_s1 }
 0x3ff   :  { %945 = vrot.lane.b32.xlu0 %v2632_v13, %s2471_s20 }
 0x403   :  { %1049 = vrot.lane.b32.xlu0 %v2628_v12, %s2472_s21 }
 0x46e   :  { %v693_v3 = vpop.xlane.xlu1 %692 }
 0x46f   :  { %v697_v4 = vsub.f32 %v689_v59, %v693_v3 }
 0x471   :  { %v699_v6 = vmul.f32 1.442695, %v697_v4 }
 0x472   :  { %v696_v9 = vpop.xlane.xlu0 %695  ;;  %v868_v17 = vpop.permute.xlu1 %867 }
 0x473   :  { %2327 = vpow2.f32 %v699_v6  ;;  %v698_v10 = vsub.f32 %v690_v0, %v696_v9 }
 0x475   :  { %v701_v11 = vmul.f32 1.442695, %v698_v10 }
 0x476   :  { %v948_v14 = vpop.permute.xlu0 %947  ;;  %v1126_v20 = vpop.permute.xlu1 %1125 }
 0x477   :  { %2329 = vpow2.f32 %v701_v11 }
 0x47a   :  { %v946_v15 = vpop.permute.xlu0 %945  ;;  %v1206_v37 = vpop.permute.xlu1 %1205 }
 0x47d   :  { %v2724_v16 = vpop.eup %2327 }
 0x47e   :  { %2172 = vmatmul.mubr.msk.f32.vlgmr.msra.gmra.mrb[4].mxu0 %vm187_vm2, %v2724_v16  ;;  %v1050_v19 = vpop.permute.xlu0 %1049  ;;  %v703_v24 = vsel %vm187_vm2, %v2724_v16, 0.0 }
 0x47f   :  { %2180 = vmatpush3.xpose.msk.msra.mxu0 %vm187_vm2, %v870_v2  ;;  %2181 = vmatprep.mubr.msk.f32.mxu0 %vm2463_vm1, %v2462_v8 }
 0x480   :  { %2189 = vmatprep.subr.mxu0 %v2462_v8 }
 0x481   :  { %v2732_v18 = vpop.eup %2329 }
 0x482   :  { %2177 = vmatmul.mubr.msk.f32.vlgmr.msra.gmra.mrb[10].mxu1 %vm187_vm2, %v2732_v18  ;;  %2182 = vmatmul.mubr.msk.f32.vlgmr.msra.gmra.mrb[6].mxu0 %vm187_vm2, %v868_v17  ;;  %v706_v3 = vsel %vm187_vm2, %v2732_v18, 0.0  ;;  %v367_v18 = vsel %vm187_vm2, %v2682_v48, 0.0 }
 0x483   :  { %2185 = vmatpush3.xpose.msk.msra.mxu1 %vm187_vm2, %v948_v14  ;;  %2190 = vmatpush3.msra.mxu0 %v1050_v19 }
 0x484   :  { %2186 = vmatprep.mubr.msk.f32.mxu1 %vm2463_vm1, %v2462_v8  ;;  %2194 = vmatprep.subr.mxu1 %v2462_v8 }
 0x485   :  { %2191 = vmatprep.mubr.msk.f32.mxu0 %vm2463_vm1, %v2462_v8  ;;  %2199 = vmatprep.subr.mxu0 %v2462_v8 }
 0x486   :  { %2187 = vmatmul.mubr.msk.f32.vlgmr.msra.gmra.mrb[12].mxu1 %vm187_vm2, %v946_v15 }
 0x487   :  { %2195 = vmatpush3.msra.mxu1 %v1126_v20  ;;  %2196 = vmatprep.mubr.msk.f32.mxu1 %vm2463_vm1, %v2462_v8  ;;  %v370_v20 = vsel %vm187_vm2, %v2690_v49, 0.0 }
 0x488   :  { %2204 = vmatprep.subr.mxu1 %v2462_v8 }
 0x551   :  { %v2748_v21 = vpop.f32.mrb[4].mxu0 }
 0x552   :  { %v2173_v22 = vpop.f32.mrb[5].mxu0 }
 0x555   :  { %v2750_v23 = vpop.f32.mrb[10].mxu1  ;;  %v941_v25 = vpop.f32.mrb[6].mxu0 }
 0x556   :  { %v1023_v26 = vmul.f32 0.35355338, %v941_v25  ;;  %v2178_v28 = vpop.f32.mrb[11].mxu1  ;;  %v2183_v29 = vpop.f32.mrb[7].mxu0 }
 0x558   :  { %v1025_v30 = vsel %vm351_vm5, -1e+09, %v1023_v26 }
 0x559   :  { %v1019_v31 = vpop.f32.mrb[12].mxu1  ;;  %v1027_v32 = vsel %vm187_vm2, %v1025_v30, -inf }
 0x55a   :  { %v1024_v33 = vmul.f32 0.35355338, %v1019_v31  ;;  %1028 = vmax.xlane.f32.xlu1 %v1027_v32  ;;  %v2188_v34 = vpop.f32.mrb[13].mxu1 }
 0x55c   :  { %v1026_v35 = vsel %vm352_vm6, -1e+09, %v1024_v33 }
 0x55d   :  { %v1030_v36 = vsel %vm187_vm2, %v1026_v35, -inf }
 0x55e   :  { %1031 = vmax.xlane.f32.xlu0 %v1030_v36 }
 0x56b   :  { %1203 = vrot.lane.b32.xlu1 %v2628_v12, %s2474_s22 }
 0x574   :  { %1283 = vrot.lane.b32.xlu0 %v2632_v13, %s2473_s7 }
 0x578   :  { %1281 = vrot.lane.b32.xlu0 %v2632_v13, %s2474_s22 }
 0x5e7   :  { %v1029_v38 = vpop.xlane.xlu1 %1028 }
 0x5e8   :  { %v1033_v39 = vsub.f32 %v1025_v30, %v1029_v38  ;;  %v1574_v38 = vld [vmem:[%s2922_s4 + $0x18] sm:$0xff] }
 0x5ea   :  { %v1035_v40 = vmul.f32 1.442695, %v1033_v39 }
 0x5eb   :  { %v1032_v41 = vpop.xlane.xlu0 %1031  ;;  %v1204_v47 = vpop.permute.xlu1 %1203 }
 0x5ec   :  { %2331 = vpow2.f32 %v1035_v40  ;;  %v1034_v42 = vsub.f32 %v1026_v35, %v1032_v41  ;;  %v1571_v35 = vld [vmem:[%s2922_s4] sm:$0xff] }
 0x5ee   :  { %v1037_v43 = vmul.f32 1.442695, %v1034_v42 }
 0x5ef   :  { %v1284_v45 = vpop.permute.xlu0 %1283 }
 0x5f0   :  { %2333 = vpow2.f32 %v1037_v43 }
 0x5f3   :  { %v1282_v50 = vpop.permute.xlu0 %1281 }
 0x5f6   :  { %v2332_v44 = vpop.eup %2331 }
 0x5f7   :  { %2192 = vmatmul.mubr.msk.f32.vlgmr.msra.gmra.mrb[8].mxu0 %vm187_vm2, %v2332_v44  ;;  %v1039_v27 = vsel %vm187_vm2, %v2332_v44, 0.0 }
 0x5f8   :  { %2200 = vmatpush3.xpose.msk.msra.mxu0 %vm187_vm2, %v1206_v37  ;;  %2201 = vmatprep.mubr.msk.f32.mxu0 %vm2463_vm1, %v2462_v8  ;;  %v1573_v37 = vld [vmem:[%s2922_s4 + $0x10] sm:$0xff] }
 0x5f9   :  { %2209 = vmatprep.subr.mxu0 %v2462_v8  ;;  %v2272_v39 = vpack.c.bf16 %v1574_v38, %v1573_v37 }
 0x5fa   :  { %v2334_v46 = vpop.eup %2333 }
 0x5fb   :  { %2197 = vmatmul.mubr.msk.f32.vlgmr.msra.gmra.mrb[14].mxu1 %vm187_vm2, %v2334_v46  ;;  %2202 = vmatmul.mubr.msk.f32.vlgmr.msra.gmra.mrb[10].mxu0 %vm187_vm2, %v1204_v47  ;;  %v1042_v2 = vsel %vm187_vm2, %v2334_v46, 0.0 }
 0x5fc   :  { %2205 = vmatpush3.xpose.msk.msra.mxu1 %vm187_vm2, %v1284_v45  ;;  %2206 = vmatprep.mubr.msk.f32.mxu1 %vm2463_vm1, %v2462_v8 }
 0x5fd   :  { %2214 = vmatprep.subr.mxu1 %v2462_v8  ;;  %2211 = vmatprep.mubr.msk.f32.mxu0 %vm2463_vm1, %v2462_v8 }
 0x5ff   :  { %2207 = vmatmul.mubr.msk.f32.vlgmr.msra.gmra.mrb[16].mxu1 %vm187_vm2, %v1282_v50 }
 0x600   :  { %2216 = vmatprep.mubr.msk.f32.mxu1 %vm2463_vm1, %v2462_v8 }
 0x6ca   :  { %v2778_v51 = vpop.f32.mrb[8].mxu0 }
 0x6cb   :  { %v2193_v53 = vpop.f32.mrb[9].mxu0 }
 0x6ce   :  { %v1197_v55 = vpop.f32.mrb[14].mxu1  ;;  %v1277_v56 = vpop.f32.mrb[10].mxu0 }
 0x6cf   :  { %v1359_v57 = vmul.f32 0.35355338, %v1277_v56  ;;  %v2198_v58 = vpop.f32.mrb[15].mxu1  ;;  %v2203_v59 = vpop.f32.mrb[11].mxu0 }
 0x6d1   :  { %v1361_v60 = vsel %vm351_vm5, -1e+09, %v1359_v57 }
 0x6d2   :  { %v1355_v61 = vpop.f32.mrb[16].mxu1  ;;  %v1363_v62 = vsel %vm187_vm2, %v1361_v60, -inf }
 0x6d3   :  { %v1360_v63 = vmul.f32 0.35355338, %v1355_v61  ;;  %1364 = vmax.xlane.f32.xlu1 %v1363_v62  ;;  %v2208_v0 = vpop.f32.mrb[17].mxu1 }
 0x6d5   :  { %v1362_v8 = vsel %vm352_vm6, -1e+09, %v1360_v63 }
 0x6d6   :  { %v1366_v1 = vsel %vm187_vm2, %v1362_v8, -inf }
 0x6d7   :  { %1367 = vmax.xlane.f32.xlu0 %v1366_v1 }
 0x6e4   :  { %1461 = vrot.lane.b32.xlu1 %v2632_v13, %s2475_s23 }
 0x6ed   :  { %1385 = vrot.lane.b32.xlu0 %v2628_v12, %s2475_s23 }
 0x708   :  { %704 = vadd.xlane.f32.xlu1 %v703_v24 }
 0x70c   :  { %1043 = vadd.xlane.f32.xlu1 %v1042_v2  ;;  %707 = vadd.xlane.f32.xlu0 %v706_v3 }
 0x710   :  { %1040 = vadd.xlane.f32.xlu0 %v1039_v27 }
 0x760   :  { %v1365_v4 = vpop.xlane.xlu1 %1364 }
 0x761   :  { %v1369_v6 = vsub.f32 %v1361_v60, %v1365_v4 }
 0x763   :  { %v1371_v9 = vmul.f32 1.442695, %v1369_v6 }
 0x764   :  { %v1462_v13 = vpop.permute.xlu1 %1461  ;;  %v1368_v10 = vpop.xlane.xlu0 %1367 }
 0x765   :  { %2335 = vpow2.f32 %v1371_v9  ;;  %v1370_v12 = vsub.f32 %v1362_v8, %v1368_v10  ;;  %2215 = vmatpush3.msra.mxu1 %v1462_v13 }
 0x767   :  { %v1373_v11 = vmul.f32 1.442695, %v1370_v12 }
 0x768   :  { %v1386_v14 = vpop.permute.xlu0 %1385 }
 0x769   :  { %2337 = vpow2.f32 %v1373_v11  ;;  %2210 = vmatpush3.msra.mxu0 %v1386_v14 }
 0x76f   :  { %v2336_v15 = vpop.eup %2335 }
 0x770   :  { %2212 = vmatmul.mubr.msk.f32.vlgmr.msra.gmra.mrb[12].mxu0 %vm187_vm2, %v2336_v15  ;;  %v1375_v16 = vsel %vm187_vm2, %v2336_v15, 0.0 }
 0x771   :  { %1376 = vadd.xlane.f32.xlu0 %v1375_v16 }
 0x773   :  { %v2338_v17 = vpop.eup %2337 }
 0x774   :  { %2217 = vmatmul.mubr.msk.f32.vlgmr.msra.gmra.mrb[18].mxu1 %vm187_vm2, %v2338_v17  ;;  %v1378_v19 = vsel %vm187_vm2, %v2338_v17, 0.0 }
 0x775   :  { %368 = vadd.xlane.f32.xlu0 %v367_v18  ;;  %1379 = vadd.xlane.f32.xlu1 %v1378_v19 }
 0x779   :  { %371 = vadd.xlane.f32.xlu1 %v370_v20 }
 0x795   :  { %v705_v22 = vpop.xlane.xlu1 %704 }
 0x796   :  { %2339 = vrcp.f32 %v705_v22 }
 0x799   :  { %v1044_v25 = vpop.xlane.xlu1 %1043  ;;  %v708_v26 = vpop.xlane.xlu0 %707 }
 0x79a   :  { %2341 = vrcp.f32 %v1044_v25 }
 0x79b   :  { %2343 = vrcp.f32 %v708_v26  ;;  %v1711_v26 = vld [vmem:[%s2926_s8 + $0x8] sm:$0xff] }
 0x79d   :  { %v1041_v28 = vpop.xlane.xlu0 %1040 }
 0x79e   :  { %2345 = vrcp.f32 %v1041_v28 }
 0x7a0   :  { %v2340_v29 = vpop.eup %2339 }
 0x7a1   :  { %v865_v30 = vmul.f32 %v2340_v29, %v2748_v21  ;;  %v1572_v21 = vld [vmem:[%s2922_s4 + $0x8] sm:$0xff]  ;;  %v1712_v29 = vld [vmem:[%s2926_s8 + $0x10] sm:$0xff] }
 0x7a2   :  { %v2268_v36 = vpack.c.bf16 %v1572_v21, %v1571_v35  ;;  %v1808_v21 = vld [vmem:[%s2928_s10 + $0x20] sm:$0xff] }
 0x7a3   :  { %1541 = vrot.lane.b32.xlu0 %v865_v30, %s2460_s30  ;;  %v1713_v30 = vld [vmem:[%s2926_s8 + $0x18] sm:$0xff] }
 0x7a4   :  { %v2342_v48 = vpop.eup %2341  ;;  %2269 = vmatprep.subr.bf16.mxu0 %v2268_v36 }
 0x7a5   :  { %v2344_v31 = vpop.eup %2343  ;;  %v1202_v32 = vmul.f32 %v2342_v48, %v1197_v55  ;;  %2271 = vmatpush3.bf16.msra.mxu0 %v2268_v36  ;;  %v2280_v48 = vpack.c.bf16 %v1713_v30, %v1712_v29  ;;  %v1809_v36 = vld [vmem:[%s2928_s10 + $0x28] sm:$0xff]  ;;  %v2065_v29 = vld [vmem:[%s2930_s12] ss:$0 sm:$0xff]  ;;  %s2478_s12 = smov 32  }
 0x7a6   :  { %v866_v33 = vmul.f32 %v2344_v31, %v2750_v23  ;;  %2273 = vmatprep.subr.bf16.mxu0 %v2272_v39  ;;  %v1804_v31 = vld [vmem:[%s2928_s10] sm:$0xff] }
 0x7a7   :  { %1551 = vrot.lane.b32.xlu0 %v1202_v32, %s2476_s24  ;;  %v1805_v32 = vld [vmem:[%s2928_s10 + $0x8] sm:$0xff] }
 0x7a8   :  { %v2346_v49 = vpop.eup %2345  ;;  %1543 = vrot.lane.b32.xlu1 %v866_v33, %s2460_s30  ;;  %v1806_v33 = vld [vmem:[%s2928_s10 + $0x10] sm:$0xff] }
 0x7a9   :  { %v1201_v34 = vmul.f32 %v2346_v49, %v2778_v51  ;;  %2275 = vmatpush3.bf16.msra.mxu0 %v2272_v39  ;;  %v2284_v49 = vpack.c.bf16 %v1805_v32, %v1804_v31  ;;  %v2066_v31 = vld [vmem:[%s2931_s13] ss:$0 sm:$0xff]  ;;  %s2479_s13 = smov [#allocation8]  }
 0x7aa   :  { %s2017_s21 = sshll.u32 %s2479_s13, 4  ;;  %s2018_s21 = int_to_ptr.vmem [resolvable:$true] %s2017_s21 }
 0x7ab   :  { %2285 = vmatprep.subr.bf16.mxu0 %v2284_v49  ;;  %p2434_p11 = scmp.lt.s32.totalorder %s2018_s21, %s2018_s21 }
 0x7ac   :  { %1549 = vrot.lane.b32.xlu1 %v1201_v34, %s2476_s24  ;;  %v1807_v34 = vld [vmem:[%s2928_s10 + $0x18] sm:$0xff] }
 0x7ad   :  { %v2288_v35 = vpack.c.bf16 %v1807_v34, %v1806_v33 }
 0x7fe   :  { %v1377_v23 = vpop.xlane.xlu0 %1376 }
 0x7ff   :  { %2347 = vrcp.f32 %v1377_v23  ;;  %v2292_v23 = vpack.c.bf16 %v1809_v36, %v1808_v21 }
 0x802   :  { %v1380_v40 = vpop.xlane.xlu1 %1379  ;;  %v369_v51 = vpop.xlane.xlu0 %368 }
 0x803   :  { %2349 = vrcp.f32 %v1380_v40 }
 0x804   :  { %2351 = vrcp.f32 %v369_v51 }
 0x806   :  { %v372_v53 = vpop.xlane.xlu1 %371 }
 0x807   :  { %2353 = vrcp.f32 %v372_v53 }
 0x809   :  { %v2348_v41 = vpop.eup %2347 }
 0x80d   :  { %v2350_v45 = vpop.eup %2349 }
 0x80e   :  { %v2352_v56 = vpop.eup %2351 }
 0x80f   :  { %v529_v60 = vmul.f32 %v2352_v56, %v2706_v52  ;;  %v2054_v52 = vld [vmem:[%s2923_s5] ss:$0 sm:$0xff] }
 0x811   :  { %v2354_v58 = vpop.eup %2353 }
 0x812   :  { %v530_v62 = vmul.f32 %v2354_v58, %v2708_v54  ;;  %v1811_v58 = vld [vmem:[%s2928_s10 + $0x38] sm:$0xff] }
 0x815   :  { %v1542_v57 = vpop.permute.xlu0 %1541 }
 0x816   :  { %v1563_v61 = vsel %vm187_vm2, %v529_v60, %v1542_v57  ;;  %v1810_v57 = vld [vmem:[%s2928_s10 + $0x30] sm:$0xff] }
 0x817   :  { %v2059_v60 = vld [vmem:[#allocation7] ss:$0 sm:$0xff] }
 0x819   :  { %v1552_v63 = vpop.permute.xlu0 %1551 }
 0x81a   :  { %v1544_v55 = vpop.permute.xlu1 %1543 }
 0x81b   :  { %v1564_v1 = vsel %vm187_vm2, %v530_v62, %v1544_v55 }
 0x81c   :  { %v1567_v2 = vsel %vm1565_vm8, %v1564_v1, %v1552_v63 }
 0x81e   :  { %v1550_v59 = vpop.permute.xlu1 %1549 }
 0x81f   :  { %v1566_v0 = vsel %vm1565_vm8, %v1563_v61, %v1550_v59  ;;  %v2296_v59 = vpack.c.bf16 %v1811_v58, %v1810_v57 }
 0x843   :  { %v1457_v42 = vpop.f32.mrb[12].mxu0 }
 0x844   :  { %v1537_v43 = vmul.f32 %v2348_v41, %v1457_v42  ;;  %v2213_v44 = vpop.f32.mrb[13].mxu0 }
 0x845   :  { %v2057_v44 = vld [vmem:[%s2924_s6] ss:$0 sm:$0xff] }
 0x846   :  { %1557 = vrot.lane.b32.xlu1 %v1537_v43, %s2477_s17 }
 0x847   :  { %v1533_v46 = vpop.f32.mrb[18].mxu1 }
 0x848   :  { %v1538_v47 = vmul.f32 %v2350_v45, %v1533_v46  ;;  %v2218_v50 = vpop.f32.mrb[19].mxu1 }
 0x849   :  { %v2058_v50 = vld [vmem:[#allocation5] ss:$0 sm:$0xff] }
 0x84a   :  { %1559 = vrot.lane.b32.xlu0 %v1538_v47, %s2477_s17 }
 0x8b8   :  { %v1558_v8 = vpop.permute.xlu1 %1557 }
 0x8b9   :  { %v1569_v24 = vsel %vm1568_vm7, %v1566_v0, %v1558_v8 }
 0x8ba   :  { %2227 = vmatprep.mubr.msk.f32.mxu0 %vm102_vm0, %v1569_v24  ;;  %v2062_v24 = vld [vmem:[%s2929_s11] ss:$0 sm:$0xff] }
 0x8bc   :  { %v1560_v3 = vpop.permute.xlu0 %1559 }
 0x8bd   :  { %v1570_v27 = vsel %vm1568_vm7, %v1567_v2, %v1560_v3 }
 0x8be   :  { %2228 = vmatmul.mubr.msk.f32.vlgmr.msra.gmra.mrb[14].mxu0 %vm102_vm0, %v1570_v27 }
 0x8bf   :  { %2287 = vmatpush3.bf16.msra.mxu0 %v2284_v49 }
 0x8c0   :  { %2289 = vmatprep.subr.bf16.mxu0 %v2288_v35 }
 0x8c3   :  { %2291 = vmatpush3.bf16.msra.mxu0 %v2288_v35 }
 0x8c4   :  { %2293 = vmatprep.subr.bf16.mxu0 %v2292_v23 }
 0x8c7   :  { %2295 = vmatpush3.bf16.msra.mxu0 %v2292_v23 }
 0x8c8   :  { %2297 = vmatprep.subr.bf16.mxu0 %v2296_v59 }
 0x8cb   :  { %2299 = vmatpush3.bf16.msra.mxu0 %v2296_v59 }
 0x991   :  { %v2229_v4 = vpop.f32.mrb[14].mxu0 }
 0x992   :  { %v1660_v54 = vadd.f32 %v2229_v4, %v2054_v52  ;;  %v1654_v6 = vpop.f32.mrb[15].mxu0 }
 0x993   :  { %v1655_v9 = vadd.f32 %v2054_v52, %v1654_v6 }
 0x994   :  { %v1664_v13 = vadd.f32 %v1660_v54, %v2615_v7 }
 0x995   :  { %v1663_v10 = vadd.f32 %v1655_v9, %v2611_v5  ;;  %v1710_v5 = vld [vmem:[%s2926_s8] sm:$0xff] }
 0x996   :  { %v1670_v12 = vsel %vm102_vm0, %v1664_v13, 0.0  ;;  %v2276_v28 = vpack.c.bf16 %v1711_v26, %v1710_v5 }
 0x997   :  { %1671 = vadd.xlane.f32.xlu0 %v1670_v12  ;;  %v1667_v11 = vsel %vm102_vm0, %v1663_v10, 0.0 }
 0x998   :  { %1668 = vadd.xlane.f32.xlu1 %v1667_v11  ;;  %2277 = vmatprep.subr.bf16.mxu1 %v2276_v28 }
 0x999   :  { %2279 = vmatpush3.bf16.msra.mxu1 %v2276_v28 }
 0x99a   :  { %2281 = vmatprep.subr.bf16.mxu1 %v2280_v48 }
 0x99d   :  { %2283 = vmatpush3.bf16.msra.mxu1 %v2280_v48 }
 0xa24   :  { %v1672_v14 = vpop.xlane.xlu0 %1671 }
 0xa25   :  { %v1675_v15 = vmul.f32 0.03125, %v1672_v14  ;;  %v1669_v16 = vpop.xlane.xlu1 %1668 }
 0xa26   :  { %v1674_v17 = vmul.f32 0.03125, %v1669_v16 }
 0xa27   :  { %v1677_v18 = vsub.f32 %v1664_v13, %v1675_v15 }
 0xa28   :  { %v1676_v19 = vsub.f32 %v1663_v10, %v1674_v17 }
 0xa29   :  { %v1679_v20 = vmul.f32 %v1677_v18, %v1677_v18 }
 0xa2a   :  { %v1678_v22 = vmul.f32 %v1676_v19, %v1676_v19 }
 0xa2b   :  { %v1683_v25 = vsel %vm102_vm0, %v1679_v20, 0.0 }
 0xa2c   :  { %1684 = vadd.xlane.f32.xlu1 %v1683_v25  ;;  %v1680_v7 = vsel %vm102_vm0, %v1678_v22, 0.0 }
 0xa2d   :  { %1681 = vadd.xlane.f32.xlu0 %v1680_v7 }
 0xab9   :  { %v1685_v37 = vpop.xlane.xlu1 %1684 }
 0xaba   :  { %v1687_v38 = vmul.f32 0.03125, %v1685_v37  ;;  %v1682_v39 = vpop.xlane.xlu0 %1681 }
 0xabb   :  { %v1686_v40 = vmul.f32 0.03125, %v1682_v39 }
 0xabc   :  { %v1689_v41 = vadd.f32 1e-05, %v1687_v38 }
 0xabd   :  { %v1688_v42 = vadd.f32 1e-05, %v1686_v40 }
 0xabe   :  { %2355 = vrsqrt.f32 %v1689_v41 }
 0xabf   :  { %2357 = vrsqrt.f32 %v1688_v42 }
 0xac8   :  { %v2356_v43 = vpop.eup %2355 }
 0xac9   :  { %v2358_v45 = vpop.eup %2357  ;;  %v1693_v46 = vmul.f32 %v2356_v43, %v1677_v18 }
 0xaca   :  { %v1692_v47 = vmul.f32 %v2358_v45, %v1676_v19 }
 0xacb   :  { %v1701_v51 = vmul.f32 %v2057_v44, %v1693_v46 }
 0xacc   :  { %v1700_v53 = vmul.f32 %v2057_v44, %v1692_v47 }
 0xacd   :  { %v1709_v56 = vadd.f32 %v2058_v50, %v1701_v51 }
 0xace   :  { %v1708_v55 = vadd.f32 %v2058_v50, %v1700_v53 }
 0xad0   :  { %2238 = vmatprep.mubr.msk.f32.mxu1 %vm102_vm0, %v1708_v55 }
 0xad1   :  { %2239 = vmatmul.mubr.msk.f32.vlgmr.msra.gmra.mrb[20].mxu1 %vm102_vm0, %v1709_v56 }
 0xba4   :  { %v2240_v61 = vpop.f32.mrb[20].mxu1 }
 0xba5   :  { %v1799_v62 = vadd.f32 %v2240_v61, %v2059_v60  ;;  %v1793_v63 = vpop.f32.mrb[21].mxu1 }
 0xba6   :  { %v1794_v0 = vadd.f32 %v2059_v60, %v1793_v63 }
 0xba7   :  { %v1803_v1 = vmax.f32 %v1799_v62, 0.0 }
 0xba8   :  { %v1802_v8 = vmax.f32 %v1794_v0, 0.0 }
 0xbaa   :  { %2257 = vmatprep.mubr.msk.f32.mxu0 %vm1819_vm9, %v1802_v8 }
 0xbab   :  { %2258 = vmatmul.mubr.msk.f32.vlgmr.msra.gmra.mrb[16].mxu0 %vm1819_vm9, %v1803_v1 }
 0xc7e   :  { %v2259_v2 = vpop.f32.mrb[16].mxu0 }
 0xc7f   :  { %v1898_v3 = vadd.f32 %v2259_v2, %v2062_v24  ;;  %v1892_v27 = vpop.f32.mrb[17].mxu0 }
 0xc80   :  { %v1893_v52 = vadd.f32 %v2062_v24, %v1892_v27 }
 0xc81   :  { %v1902_v4 = vadd.f32 %v1898_v3, %v1709_v56 }
 0xc82   :  { %v1901_v54 = vadd.f32 %v1893_v52, %v1708_v55 }
 0xc83   :  { %v1908_v6 = vsel %vm102_vm0, %v1902_v4, 0.0 }
 0xc84   :  { %1909 = vadd.xlane.f32.xlu1 %v1908_v6  ;;  %v1905_v9 = vsel %vm102_vm0, %v1901_v54, 0.0 }
 0xc85   :  { %1906 = vadd.xlane.f32.xlu0 %v1905_v9 }
 0xd11   :  { %v1910_v13 = vpop.xlane.xlu1 %1909 }
 0xd12   :  { %v1912_v10 = vmul.f32 0.03125, %v1910_v13  ;;  %v1907_v12 = vpop.xlane.xlu0 %1906 }
 0xd13   :  { %v1911_v11 = vmul.f32 0.03125, %v1907_v12 }
 0xd14   :  { %v1914_v14 = vsub.f32 %v1902_v4, %v1912_v10 }
 0xd15   :  { %v1913_v15 = vsub.f32 %v1901_v54, %v1911_v11 }
 0xd16   :  { %v1916_v16 = vmul.f32 %v1914_v14, %v1914_v14 }
 0xd17   :  { %v1915_v17 = vmul.f32 %v1913_v15, %v1913_v15 }
 0xd18   :  { %v1920_v18 = vsel %vm102_vm0, %v1916_v16, 0.0 }
 0xd19   :  { %1921 = vadd.xlane.f32.xlu1 %v1920_v18  ;;  %v1917_v19 = vsel %vm102_vm0, %v1915_v17, 0.0 }
 0xd1a   :  { %1918 = vadd.xlane.f32.xlu0 %v1917_v19 }
 0xda6   :  { %v1922_v20 = vpop.xlane.xlu1 %1921 }
 0xda7   :  { %v1924_v22 = vmul.f32 0.03125, %v1922_v20  ;;  %v1919_v25 = vpop.xlane.xlu0 %1918 }
 0xda8   :  { %v1923_v7 = vmul.f32 0.03125, %v1919_v25 }
 0xda9   :  { %v1926_v5 = vadd.f32 1e-05, %v1924_v22 }
 0xdaa   :  { %v1925_v26 = vadd.f32 1e-05, %v1923_v7 }
 0xdab   :  { %2359 = vrsqrt.f32 %v1926_v5 }
 0xdac   :  { %2361 = vrsqrt.f32 %v1925_v26 }
 0xdb5   :  { %v2360_v28 = vpop.eup %2359 }
 0xdb6   :  { %v2362_v30 = vpop.eup %2361  ;;  %v1930_v48 = vmul.f32 %v2360_v28, %v1914_v14 }
 0xdb7   :  { %v1929_v32 = vmul.f32 %v2362_v30, %v1913_v15 }
 0xdb8   :  { %v1938_v33 = vmul.f32 %v2065_v29, %v1930_v48 }
 0xdb9   :  { %v1937_v49 = vmul.f32 %v2065_v29, %v1929_v32 }
 0xdba   :  { %v1946_v34 = vadd.f32 %v2066_v31, %v1938_v33 }
 0xdbb   :  { %v1945_v35 = vadd.f32 %v2066_v31, %v1937_v49 }
 0xdbc   :  { %v1975_v21 = vrot.slane %v1946_v34, 4  ;;  %v1959_v37 = vrot.slane %v1946_v34, 1  ;;  %v1981_v38 = vrot.slane %v1946_v34, 5  ;;  %v1971_v39 = vrot.slane %v1946_v34, 3 }
 0xdbd   :  { %v1974_v36 = vrot.slane %v1945_v35, 5  ;;  %v1953_v23 = vrot.slane %v1945_v35, 1  ;;  %v1958_v42 = vrot.slane %v1945_v35, 2  ;;  %v1980_v43 = vrot.slane %v1945_v35, 6 }
 0xdbe   :  { %v1970_v44 = vrot.slane %v1945_v35, 4  ;;  %v1949_v45 = vrot.slane %v1946_v34, 7  ;;  %v1964_v46 = vrot.slane %v1945_v35, 3  ;;  %v1965_v47 = vrot.slane %v1946_v34, 2 }
 0xdbf   :  { %v1976_v40 = vsel %vm1950_vm10, %v1975_v21, %v1974_v36  ;;  %v1954_v41 = vsel %vm1950_vm10, %v1946_v34, %v1953_v23  ;;  %v1960_v53 = vsel %vm1950_vm10, %v1959_v37, %v1958_v42  ;;  %v1982_v55 = vsel %vm1950_vm10, %v1981_v38, %v1980_v43 }
 0xdc0   :  { %1977 = vrot.lane.b32.xlu1 %v1976_v40, %s2478_s12  ;;  %1955 = vrot.lane.b32.xlu0 %v1954_v41, %s2478_s12  ;;  %v1972_v50 = vsel %vm1950_vm10, %v1971_v39, %v1970_v44  ;;  %v1951_v51 = vsel %vm1950_vm10, %v1949_v45, %v1945_v35  ;;  %v1986_v56 = vrot.slane %v1945_v35, 7  ;;  %v1987_v57 = vrot.slane %v1946_v34, 6 }
 0xdc1   :  { %v1966_v58 = vsel %vm1950_vm10, %v1965_v47, %v1964_v46 }
 0xdc2   :  { %v1988_v59 = vsel %vm1950_vm10, %v1987_v57, %v1986_v56 }
 0xdc4   :  { %1961 = vrot.lane.b32.xlu1 %v1960_v53, %s2465_s29  ;;  %1983 = vrot.lane.b32.xlu0 %v1982_v55, %s2465_s29 }
 0xdc8   :  { %1967 = vrot.lane.b32.xlu1 %v1966_v58, %s2464_s28  ;;  %1989 = vrot.lane.b32.xlu0 %v1988_v59, %s2464_s28  ;;  %s2429_s28 = scalar_lea.vmem %s2018_s21, 64 }
 0xdc9   :  { %p2430_p10 = scmp.ne.s32.totalorder %s2018_s21, %s2429_s28  ;;  %p2435_p12 = scmp.lt.s32.totalorder %s2429_s28, %s2429_s28 }
 0xdcb   :  { %p2436_p13 = por %p2435_p12, %p2434_p11 }
 0xdcd   :  { %p2437_p0 = pnand %p2436_p13, %p2430_p10 }
 0xe32   :  { %v1978_v60 = vpop.permute.xlu1 %1977  ;;  %v1956_v61 = vpop.permute.xlu0 %1955 }
 0xe33   :  { %v1996_v0 = vsel %vm102_vm0, %v1972_v50, %v1978_v60  ;;  %v1992_v8 = vsel %vm102_vm0, %v1951_v51, %v1956_v61 }
 0xe36   :  { %v1962_v62 = vpop.permute.xlu1 %1961  ;;  %v1984_v63 = vpop.permute.xlu0 %1983 }
 0xe37   :  { %v1993_v1 = vsel %vm1819_vm9, %v1992_v8, %v1962_v62  ;;  %v1997_v24 = vsel %vm1819_vm9, %v1996_v0, %v1984_v63 }
 0xe3a   :  { %v1968_v2 = vpop.permute.xlu1 %1967  ;;  %v1990_v3 = vpop.permute.xlu0 %1989 }
 0xe3b   :  { %v1995_v27 = vsel %vm1994_vm11, %v1993_v1, %v1968_v2  ;;  %v1998_v52 = vsel %vm1994_vm11, %v1997_v24, %v1990_v3 }
 0xe3c   :  { %v2001_v4 = vcombine.low %v1995_v27, %v1998_v52 }
 0xe3e   :  { %2067 = vst.sshfl [vmem:[#allocation8] sm:$0x33 pattern:$0x76325410] %v2001_v4 }
 0xe3f   :  { %2440 = shalt.err (!%p2437_p0)
}
 0xe40   :  { %s2441_s22 = scalar_lea.hbm %s2932_s14, 64 }
 0xe41   :  { %p2442_p1 = scmp.ne.s32.totalorder %s2932_s14, %s2441_s22  ;;  %p2445_p2 = scmp.lt.u32.totalorder %s2441_s22, %s2932_s14 }
 0xe43   :  { %p2447_p3 = pnand %p2445_p2, %p2442_p1 }
 0xe45   :  { %2450 = shalt.err (!%p2447_p3)
}
 0xe46   :  { %2020 = dma.vmem_to_hbm [thread:$0]  %s2018_s21, 64, %s2932_s14, [#allocation4]  }
 0xe47   :  { %2455 = dma.done.wait [#allocation4], 64  }
 0xe48   :  { %2456 = vsyncadd [#allocation4], 4294967232 }
 0xe49   :  { %2024 = vsyncpa [#allocation3], 1 }
 0xe4a   :  { %2025 = vsyncpa [#allocation6], 1 }
 0xe4b   :  { %2026 = vsyncpa [#allocation4], 1 }

</bundles_post_ra>
